<compile_context>
chip_gen: v7x
topology: tpu7x:2x2x1
jax: 0.10.0
libtpu: 0.0.40
codegen_flags: <defaults>
</compile_context>

<pallas_src>
import functools

import numpy as np
import jax
import jax.numpy as jnp
from jax import lax
from jax.experimental import pallas as pl
from jax.experimental.pallas import tpu as pltpu

# ---- "GlobalToolConfig" constants (synthetic, defined in-script) ----
DEPENDENCY_TOKEN_START = 1000
NUM_DEPENDENCY = 16            # vocab = NUM_DEPENDENCY + 1 = 17
EMBED_DIM = 128                # lane-dense embedding dim


def _round_up(n, m):
    return -(-n // m) * m


def _choose_token_tile(n_tokens, max_tile):
    """Token tile: multiple of 128 (lane-major index block + bf16 output sublane
    packing), capped at max_tile. Small N -> a single step (per-step writeback is
    below the ~0.35us per-step overhead, so forced splits are pure cost); for
    N >= 4*max_tile the grid has >=4 steps automatically (>=2 per v7x TC)."""
    assert max_tile % 128 == 0 and max_tile >= 128
    return min(max_tile, _round_up(max(n_tokens, 1), 128))


def _dependency_tokens_kernel(idx_ref, table_ref, out_ref, *, precision):
    # idx_ref:   (1, 1, T) int32    lane-major token ids (contiguous DMA)
    # table_ref: (Vp, D)   bf16/f32 zero-padded table, resident across grid steps
    # out_ref:   (T, D)    bf16 (default) or f32
    T = out_ref.shape[0]
    Vp = table_ref.shape[0]
    ids = idx_ref[0]                                                # (1, T)
    # Offset folded into the iota comparison; one-hot is exact 0/1 in any dtype.
    v_iota = (lax.broadcasted_iota(jnp.int32, (Vp, T), 0)
              + DEPENDENCY_TOKEN_START)                             # (Vp, T)
    one_hot_t = (ids == v_iota).astype(table_ref.dtype)             # (Vp, T)
    # (T, D) = one_hot_t^T @ table  (contraction over dim 0 of both operands —
    # same TN dot_general form used by flash-attention dkv kernels).
    acc = lax.dot_general(
        one_hot_t, table_ref[...],
        dimension_numbers=(((0,), (0,)), ((), ())),
        preferred_element_type=jnp.float32,
        precision=precision)
    out_ref[...] = acc.astype(out_ref.dtype)


def dependency_tokens_forward(x, table, *, max_token_tile=2048,
                              mxu_dtype=jnp.bfloat16,
                              out_dtype=jnp.bfloat16,
                              min_pallas_tokens=0):
    """x: int (B, S) token ids; table: float32 (V, D). Returns (B, S, D) in out_dtype.

    Defaults follow the perf review: bf16 MXU inputs (one-hot is exact; table sees
    <= ~2^-9 relative rounding) and bf16 output (halves HBM writeback). Use
    mxu_dtype=out_dtype=jnp.float32 for a bit-exact gather (slower; emulated MXU
    on v7x)."""
    B, S = x.shape
    V, D = table.shape
    N = B * S

    # Optional tiny-N bypass (launch + pipeline overhead dominates below a few
    # hundred tokens). Disabled by default so the Pallas path is always exercised.
    if N < min_pallas_tokens:
        return jnp.take(table, x.astype(jnp.int32) - DEPENDENCY_TOKEN_START,
                        axis=0).astype(out_dtype)

    # Pad the vocab once to a clean sublane size with zero rows; padded rows only
    # ever multiply against zero one-hot entries -> exact.
    V_pad = max(32, _round_up(V, 8))
    table_pad = jnp.zeros((V_pad, D), table.dtype).at[:V, :].set(table)
    table_mxu = table_pad.astype(mxu_dtype)

    tile = _choose_token_tile(N, max_token_tile)
    num_tiles = pl.cdiv(N, tile)
    N_pad = num_tiles * tile

    idx_flat = x.reshape(N).astype(jnp.int32)
    if N_pad != N:
        idx_flat = jnp.pad(idx_flat, (0, N_pad - N),
                           constant_values=DEPENDENCY_TOKEN_START)
    # Lane-major index layout: block last-two dims (1, tile) == full array dims,
    # so the HBM->VMEM copy is contiguous (no 4-byte strided writes, no 128x
    # sublane bloat of a (tile, 1) column block).
    idx_lanes = idx_flat.reshape(num_tiles, 1, tile)

    f32_exact = np.dtype(mxu_dtype) == np.dtype(jnp.float32)
    precision = lax.Precision.HIGHEST if f32_exact else None

    cost = pl.CostEstimate(
        flops=2 * N_pad * V_pad * D,
        transcendentals=0,
        bytes_accessed=(N_pad * 4
                        + V_pad * D * np.dtype(mxu_dtype).itemsize
                        + N_pad * D * np.dtype(out_dtype).itemsize))

    out_flat = pl.pallas_call(
        functools.partial(_dependency_tokens_kernel, precision=precision),
        out_shape=jax.ShapeDtypeStruct((N_pad, D), out_dtype),
        grid_spec=pltpu.PrefetchScalarGridSpec(
            num_scalar_prefetch=0,
            grid=(num_tiles,),
            in_specs=[
                # per-tile slice of lane-major token indices
                pl.BlockSpec((1, 1, tile), lambda i: (i, 0, 0)),
                # full (padded) embedding table, same block every step -> resident
                pl.BlockSpec((V_pad, D), lambda i: (0, 0)),
            ],
            out_specs=pl.BlockSpec((tile, D), lambda i: (i, 0)),
        ),
        compiler_params=pltpu.CompilerParams(
            dimension_semantics=("parallel",)),
        cost_estimate=cost,
    )(idx_lanes, table_mxu)

    return out_flat[:N].reshape(B, S, D)


if __name__ == "__main__":
    key = jax.random.PRNGKey(0)
    k_table, k_idx1, k_idx2 = jax.random.split(key, 3)

    # Deterministic "parameters": nn.Embedding(num_dependency + 1, embed_dim).weight
    V = NUM_DEPENDENCY + 1
    table = jax.random.normal(k_table, (V, EMBED_DIM), dtype=jnp.float32)

    # Small shape consistent with the module: (B, S) token ids in-vocab.
    B, S = 2, 8
    x = jax.random.randint(
        k_idx1, (B, S),
        minval=DEPENDENCY_TOKEN_START,
        maxval=DEPENDENCY_TOKEN_START + V,
        dtype=jnp.int32,
    )
    ref = jnp.take(table, x - DEPENDENCY_TOKEN_START, axis=0)

    # Default path: bf16 MXU inputs + bf16 output (halves writeback; one-hot exact,
    # table values rounded to bf16, <= ~2^-8 relative).
    out = jax.block_until_ready(dependency_tokens_forward(x, table))
    assert out.shape == (B, S, EMBED_DIM) and out.dtype == jnp.bfloat16
    assert jnp.allclose(out.astype(jnp.float32), ref, rtol=2e-2, atol=2e-2), \
        "bf16 path mismatch"

    # Correctness escape hatch: f32 MXU (Precision.HIGHEST) + f32 output is a
    # bit-exact gather. On v7x (bf16/fp8-only MXU) this path is emulated & slower.
    out_f32 = jax.block_until_ready(
        dependency_tokens_forward(x, table, mxu_dtype=jnp.float32,
                                  out_dtype=jnp.float32))
    assert out_f32.dtype == jnp.float32
    assert jnp.allclose(out_f32, ref, atol=1e-6), "f32 path mismatch"

    # Ragged shape exercising the 128-row padding path (N = 111).
    B2, S2 = 3, 37
    x2 = jax.random.randint(
        k_idx2, (B2, S2),
        minval=DEPENDENCY_TOKEN_START,
        maxval=DEPENDENCY_TOKEN_START + V,
        dtype=jnp.int32,
    )
    ref2 = jnp.take(table, x2 - DEPENDENCY_TOKEN_START, axis=0)
    out2 = jax.block_until_ready(dependency_tokens_forward(x2, table))
    assert out2.shape == (B2, S2, EMBED_DIM)
    assert jnp.allclose(out2.astype(jnp.float32), ref2, rtol=2e-2, atol=2e-2), \
        "padded-path mismatch"

    # TODO(synk): PyTorch nn.Embedding raises on out-of-range ids; this kernel
    # returns an all-zero row instead (no error-raising equivalent in Pallas).
    print("KERNEL_OK")
</pallas_src>

<mosaic_0001>
module attributes {stable_mosaic.version = 11 : i64} {
  func.func @_dependency_tokens_kernel(%arg0: i32, %arg1: memref<1x1x128xi32, #tpu.memory_space<vmem>>, %arg2: memref<32x128xbf16, #tpu.memory_space<vmem>>, %arg3: memref<128x128xbf16, #tpu.memory_space<vmem>>) attributes {dimension_semantics = [#tpu.dimension_semantics<parallel>], iteration_bounds = array<i64: 1>, scalar_prefetch = 0 : i64, scratch_operands = 0 : i64, tpu.core_type = #tpu.core_type<tc>, window_params = [{transform_indices = @transform_0, window_bounds = array<i64: 1, 1, 128>}, {pipeline_mode = #tpu.pipeline_mode<synchronous>, transform_indices = @transform_1, window_bounds = array<i64: 32, 128>}, {transform_indices = @transform_2, window_bounds = array<i64: 128, 128>}]} {
    %c0 = arith.constant 0 : index
    %c0_0 = arith.constant 0 : index
    %c0_1 = arith.constant 0 : index
    %0 = vector.load %arg1[%c0, %c0_0, %c0_1] : memref<1x1x128xi32, #tpu.memory_space<vmem>>, vector<1x1x128xi32>
    %1 = vector.shape_cast %0 : vector<1x1x128xi32> to vector<1x128xi32>
    %2 = tpu.iota {dimensions = array<i32: 0>} : vector<32x128xi32>
    %c1000_i32 = arith.constant 1000 : i32
    %3 = vector.broadcast %c1000_i32 : i32 to vector<32x128xi32>
    %4 = arith.addi %2, %3 : vector<32x128xi32>
    %5 = vector.broadcast %1 : vector<1x128xi32> to vector<32x128xi32>
    %6 = arith.cmpi eq, %5, %4 : vector<32x128xi32>
    %7 = arith.extui %6 : vector<32x128xi1> to vector<32x128xi32>
    %8 = arith.sitofp %7 : vector<32x128xi32> to vector<32x128xf32>
    %9 = arith.truncf %8 : vector<32x128xf32> to vector<32x128xbf16>
    %c0_2 = arith.constant 0 : index
    %c0_3 = arith.constant 0 : index
    %10 = vector.load %arg2[%c0_2, %c0_3] : memref<32x128xbf16, #tpu.memory_space<vmem>>, vector<32x128xbf16>
    %cst = arith.constant dense<0.000000e+00> : vector<128x128xf32>
    %11 = tpu.matmul %9, %10, %cst {dimension_numbers = #tpu.dot_dimension_numbers<[0], [0], [1], [1], [0, 1, 1, 1], [], []>} : vector<32x128xbf16>, vector<32x128xbf16>, vector<128x128xf32> -> vector<128x128xf32>
    %12 = arith.truncf %11 : vector<128x128xf32> to vector<128x128xbf16>
    %c0_4 = arith.constant 0 : index
    %c0_5 = arith.constant 0 : index
    %13 = vector.load %arg3[%c0_4, %c0_5] : memref<128x128xbf16, #tpu.memory_space<vmem>>, vector<128x128xbf16>
    tpu.vector_store %arg3[%c0_4, %c0_5], %12 {strides = array<i32>} : memref<128x128xbf16, #tpu.memory_space<vmem>>, vector<128x128xbf16>,
    return
  }
  func.func @transform_0(%arg0: i32) -> (i32, i32, i32) {
    %c0_i32 = arith.constant 0 : i32
    %c0_i32_0 = arith.constant 0 : i32
    %c0_i32_1 = arith.constant 0 : i32
    return %arg0, %c0_i32, %c0_i32_0 : i32, i32, i32
  }
  func.func @transform_1(%arg0: i32) -> (i32, i32) {
    %c0_i32 = arith.constant 0 : i32
    %c0_i32_0 = arith.constant 0 : i32
    %c0_i32_1 = arith.constant 0 : i32
    return %c0_i32, %c0_i32_0 : i32, i32
  }
  func.func @transform_2(%arg0: i32) -> (i32, i32) {
    %c0_i32 = arith.constant 0 : i32
    %c0_i32_0 = arith.constant 0 : i32
    return %arg0, %c0_i32 : i32, i32
  }
}

</mosaic_0001>

<bundles_post_ra>
// kernel: tpu_custom_call.1
= control target key start
LH: loop header
LB: loop body
LE: loop exit
PB: predicated region body
PF: predicated region fallthrough
CT: control target
= control target key end

     0   :  { %7 = vsyncpa [#allocation3], 0  ;;  %s606_s0 = inlined_call_operand.hbm [shape: s32[1,1,128], index: 0, kind: input, shape index: {}]   ;;  %s607_s1 = inlined_call_operand.hbm [shape: bf16[32,128], index: 1, kind: input, shape index: {}]   ;;  %s608_s2 = inlined_call_operand.hbm [shape: bf16[128,128], index: 2, kind: output, shape index: {}]  }
   0x1   :  { %8 = vsyncpa [#allocation6], 0 }
   0x2   :  { %9 = vsyncpa [#allocation4], 0  ;;  %s528_s9 = smov [#allocation2]   ;;  %s529_s11 = smov [#allocation5]  }
   0x3   :  { %s16_s10 = sshll.u32 %s528_s9, 4  ;;  %s25_s12 = sshll.u32 %s529_s11, 4  ;;  %s17_s10 = int_to_ptr.vmem [resolvable:$true] %s16_s10  ;;  %s549_s12 = int_to_ptr.vmem [resolvable:$true] %s25_s12 }
   0x4   :  { %s456_s15 = scalar_lea.hbm %s606_s0, 16 }
   0x5   :  { %p457_p0 = scmp.ne.s32.totalorder %s606_s0, %s456_s15  ;;  %p460_p1 = scmp.lt.u32.totalorder %s456_s15, %s606_s0 }
   0x7   :  { %p462_p2 = pnand %p460_p1, %p457_p0 }
   0x9   :  { %465 = shalt.err (!%p462_p2)
}
   0xa   :  { %s466_s20 = scalar_lea.vmem %s17_s10, 16  ;;  %s470_s21 = scalar_lea.vmem %s17_s10, 32 }
   0xb   :  { %p467_p3 = scmp.ne.s32.totalorder %s17_s10, %s466_s20  ;;  %p471_p4 = scmp.lt.s32.totalorder %s17_s10, %s17_s10 }
   0xc   :  { %p472_p5 = scmp.lt.s32.totalorder %s470_s21, %s466_s20 }
   0xe   :  { %p473_p6 = por %p472_p5, %p471_p4 }
  0x10   :  { %p474_p7 = pnand %p473_p6, %p467_p3 }
  0x12   :  { %477 = shalt.err (!%p474_p7)
}
  0x13   :  { %19 = dma.hbm_to_vmem [thread:$0]  %s606_s0, 16, %s17_s10, [#allocation3]  }
  0x14   :  { %s478_s26 = scalar_lea.hbm %s607_s1, 256 }
  0x15   :  { %p479_p8 = scmp.ne.s32.totalorder %s607_s1, %s478_s26  ;;  %p482_p9 = scmp.lt.u32.totalorder %s478_s26, %s607_s1 }
  0x17   :  { %p484_p10 = pnand %p482_p9, %p479_p8 }
  0x19   :  { %487 = shalt.err (!%p484_p10)
}
  0x1a   :  { %s488_s3 = scalar_lea.vmem %s549_s12, 256  ;;  %p493_p12 = scmp.lt.s32.totalorder %s549_s12, %s549_s12 }
  0x1b   :  { %p489_p11 = scmp.ne.s32.totalorder %s549_s12, %s488_s3  ;;  %p494_p13 = scmp.lt.s32.totalorder %s488_s3, %s488_s3 }
  0x1d   :  { %p495_p0 = por %p494_p13, %p493_p12 }
  0x1f   :  { %p496_p1 = pnand %p495_p0, %p489_p11 }
  0x21   :  { %499 = shalt.err (!%p496_p1)
}
  0x22   :  { %s530_s0 = smov 64   ;;  %s531_s4 = smov 4  }
  0x23   :  { %31 = dma.hbm_to_vmem [thread:$0]  %s607_s1, 256, %s549_s12, [#allocation6], %s530_s0, %s530_s0, %s531_s4  }
  0x24   :  { %522 = dma.done.wait [#allocation3], 16  }
  0x25   :  { %523 = vsyncadd [#allocation3], 4294967280 }
  0x26   :  { %524 = dma.done.wait [#allocation6], 256  }
  0x27   :  { %525 = vsyncadd [#allocation6], 4294967040  ;;  %v40_v0 = vlaneseq  ;;  %v319_v9 = vld [vmem:[#allocation2] ss:$0 sm:$0xff]  ;;  %v454_v10 = vld [vmem:[#allocation5] sm:$0xff]   ;;  %v532_v11 = vmov 0.0  }
  0x28   :  { %v455_v16 = vld [vmem:[#allocation5 + $0x8] sm:$0xff]   ;;  %423 = vmatprep.subr.bf16.mxu0 %v454_v10  ;;  %443 = vmatprep.subr.bf16.mxu1 %v454_v10  ;;  %vm99_vm4 = vcmask 261120   ;;  %s533_s1 = smov [#allocation7]  }
  0x29   :  { %v41_v1 = vshrl.u32 %v40_v0, 7  ;;  %424 = vmatpush3.bf16.msra.mxu0 %v454_v10  ;;  %445 = vmatpush3.bf16.msra.mxu1 %v454_v10  ;;  %s306_s7 = sshll.u32 %s533_s1, 4  ;;  %s307_s7 = int_to_ptr.vmem [resolvable:$true] %s306_s7 }
  0x2a   :  { %425 = vmatprep.subr.bf16.mxu0 %v455_v16  ;;  %444 = vmatprep.subr.bf16.mxu1 %v455_v16  ;;  %s500_s8 = scalar_lea.vmem %s307_s7, 1024  ;;  %p505_p3 = scmp.lt.s32.totalorder %s307_s7, %s307_s7 }
  0x2b   :  { %v42_v2 = vadd.s32 8, %v41_v1  ;;  %v45_v3 = vadd.s32 1000, %v41_v1  ;;  %v43_v4 = vadd.s32 16, %v41_v1  ;;  %v44_v5 = vadd.s32 24, %v41_v1  ;;  %p501_p2 = scmp.ne.s32.totalorder %s307_s7, %s500_s8  ;;  %p506_p4 = scmp.lt.s32.totalorder %s500_s8, %s500_s8 }
  0x2d   :  { %v46_v6 = vadd.s32 1000, %v42_v2  ;;  %v47_v7 = vadd.s32 1000, %v43_v4  ;;  %v48_v8 = vadd.s32 1000, %v44_v5  ;;  %vm53_vm0 = vcmp.eq.s32.totalorder %v319_v9, %v45_v3  ;;  %426 = vmatpush3.bf16.msra.mxu0 %v455_v16  ;;  %446 = vmatpush3.bf16.msra.mxu1 %v455_v16  ;;  %p507_p5 = por %p506_p4, %p505_p3 }
  0x2e   :  { %v320_v12 = vsel %vm53_vm0, 1.0, %v532_v11 }
  0x2f   :  { %vm54_vm1 = vcmp.eq.s32.totalorder %v319_v9, %v46_v6  ;;  %vm55_vm2 = vcmp.eq.s32.totalorder %v319_v9, %v47_v7  ;;  %vm56_vm3 = vcmp.eq.s32.totalorder %v319_v9, %v48_v8  ;;  %p508_p6 = pnand %p507_p5, %p501_p2 }
  0x30   :  { %v321_v13 = vsel %vm54_vm1, 1.0, %v532_v11  ;;  %v322_v14 = vsel %vm55_vm2, 1.0, %v532_v11  ;;  %v323_v15 = vsel %vm56_vm3, 1.0, %v532_v11 }
  0x31   :  { %v65_v17 = vpack.c.bf16 %v321_v13, %v320_v12  ;;  %v66_v18 = vpack.c.bf16 %v323_v15, %v322_v14 }
  0x33   :  { %71 = vxpose.xlu0.c.b16.start [1/2] (short) %v65_v17, 128 }
  0x37   :  { %72 = vxpose.xlu0.c.b16.end [2/2] (short) %v66_v18, 128 }
  0x99   :  { %v79_v19 = vpop.trf.xlu0 }
  0x9a   :  { %427 = vmatprep.mubr.msk.bf16.mxu0 %vm99_vm4, %v79_v19 }
  0x9d   :  { %v80_v20 = vpop.trf.xlu0 }
  0x9e   :  { %428 = vmatmul.mubr.msk.bf16.vlgmr.msra.gmra.mrb[0].mxu0 %vm99_vm4, %v80_v20 }
  0xa1   :  { %v81_v21 = vpop.trf.xlu0 }
  0xa2   :  { %431 = vmatprep.mubr.msk.bf16.mxu0 %vm99_vm4, %v81_v21 }
  0xa5   :  { %v82_v22 = vpop.trf.xlu0 }
  0xa6   :  { %432 = vmatmul.mubr.msk.bf16.gmra.mrb[4].mxu0 %vm99_vm4, %v82_v22 }
  0xa9   :  { %v83_v23 = vpop.trf.xlu0 }
  0xaa   :  { %435 = vmatprep.mubr.msk.bf16.mxu1 %vm99_vm4, %v83_v23 }
  0xad   :  { %v84_v24 = vpop.trf.xlu0 }
  0xae   :  { %436 = vmatmul.mubr.msk.bf16.vlgmr.msra.gmra.mrb[0].mxu1 %vm99_vm4, %v84_v24 }
  0xb1   :  { %v85_v25 = vpop.trf.xlu0 }
  0xb2   :  { %439 = vmatprep.mubr.msk.bf16.mxu1 %vm99_vm4, %v85_v25 }
  0xb5   :  { %v86_v26 = vpop.trf.xlu0 }
  0xb6   :  { %440 = vmatmul.mubr.msk.bf16.gmra.mrb[4].mxu1 %vm99_vm4, %v86_v26 }
 0x171   :  { %v429_v27 = vpop.f32.mrb[0].mxu0 }
 0x172   :  { %v158_v28 = vpop.f32.mrb[1].mxu0 }
 0x173   :  { %v430_v29 = vpop.f32.mrb[2].mxu0 }
 0x174   :  { %v374_v30 = vpack.c.bf16 %v430_v29, %v429_v27  ;;  %v161_v31 = vpop.f32.mrb[3].mxu0 }
 0x175   :  { %v369_v32 = vpack.c.bf16 %v161_v31, %v158_v28 }
 0x176   :  { %406 = vst [vmem:[#allocation7 + $0x8] sm:$0xff] %v374_v30  }
 0x177   :  { %370 = vst [vmem:[#allocation7] sm:$0xff] %v369_v32  }
 0x179   :  { %v433_v33 = vpop.f32.mrb[4].mxu0 }
 0x17a   :  { %v174_v34 = vpop.f32.mrb[5].mxu0 }
 0x17b   :  { %v434_v35 = vpop.f32.mrb[6].mxu0 }
 0x17c   :  { %v384_v36 = vpack.c.bf16 %v434_v35, %v433_v33  ;;  %v177_v37 = vpop.f32.mrb[7].mxu0 }
 0x17d   :  { %v379_v38 = vpack.c.bf16 %v177_v37, %v174_v34 }
 0x17e   :  { %408 = vst [vmem:[#allocation7 + $0x18] sm:$0xff] %v384_v36  }
 0x17f   :  { %407 = vst [vmem:[#allocation7 + $0x10] sm:$0xff] %v379_v38  }
 0x181   :  { %v437_v39 = vpop.f32.mrb[0].mxu1 }
 0x182   :  { %v190_v40 = vpop.f32.mrb[1].mxu1 }
 0x183   :  { %v438_v41 = vpop.f32.mrb[2].mxu1 }
 0x184   :  { %v394_v42 = vpack.c.bf16 %v438_v41, %v437_v39  ;;  %v193_v43 = vpop.f32.mrb[3].mxu1 }
 0x185   :  { %v389_v44 = vpack.c.bf16 %v193_v43, %v190_v40 }
 0x186   :  { %410 = vst [vmem:[#allocation7 + $0x28] sm:$0xff] %v394_v42  }
 0x187   :  { %409 = vst [vmem:[#allocation7 + $0x20] sm:$0xff] %v389_v44  }
 0x189   :  { %v441_v45 = vpop.f32.mrb[4].mxu1 }
 0x18a   :  { %v206_v46 = vpop.f32.mrb[5].mxu1 }
 0x18b   :  { %v442_v47 = vpop.f32.mrb[6].mxu1 }
 0x18c   :  { %v404_v48 = vpack.c.bf16 %v442_v47, %v441_v45  ;;  %v209_v49 = vpop.f32.mrb[7].mxu1 }
 0x18d   :  { %v399_v50 = vpack.c.bf16 %v209_v49, %v206_v46 }
 0x18e   :  { %412 = vst [vmem:[#allocation7 + $0x38] sm:$0xff] %v404_v48  }
 0x18f   :  { %411 = vst [vmem:[#allocation7 + $0x30] sm:$0xff] %v399_v50  }
 0x190   :  { %511 = shalt.err (!%p508_p6)
}
 0x191   :  { %s512_s11 = scalar_lea.hbm %s608_s2, 1024 }
 0x192   :  { %p513_p7 = scmp.ne.s32.totalorder %s608_s2, %s512_s11  ;;  %p516_p8 = scmp.lt.u32.totalorder %s512_s11, %s608_s2 }
 0x194   :  { %p518_p9 = pnand %p516_p8, %p513_p7 }
 0x196   :  { %521 = shalt.err (!%p518_p9)
}
 0x197   :  { %312 = dma.vmem_to_hbm [thread:$0]  %s307_s7, 1024, %s608_s2, [#allocation4], %s530_s0, %s530_s0, %s531_s4  }
 0x198   :  { %526 = dma.done.wait [#allocation4], 1024  }
 0x199   :  { %527 = vsyncadd [#allocation4], 4294966272 }
 0x19a   :  { %316 = vsyncpa [#allocation3], 1 }
 0x19b   :  { %317 = vsyncpa [#allocation6], 1 }
 0x19c   :  { %318 = vsyncpa [#allocation4], 1 }

</bundles_post_ra>
